<compile_context>
chip_gen: v6e
topology: v6e:2x2x1
jax: 0.10.0
libtpu: 0.0.40
codegen_flags: <defaults>
</compile_context>

<pallas_src>
import functools
import math

import jax
import jax.numpy as jnp
from jax.experimental import pallas as pl
from jax.experimental.pallas import tpu as pltpu

LANE = 128
SUBLANE = 8
MAX_BATCH_TILE = 256


def _round_up(x, m):
    return (x + m - 1) // m * m


# ---------------------------------------------------------------------------
# Fused Pallas kernel: x @ W1 -> ReLU -> @ W2 -> ReLU -> @ W3 -> log_softmax
# ---------------------------------------------------------------------------
def _fc_fused_kernel(x_ref, w1_ref, b1_ref, w2_ref, b2_ref, w3_ref, b3_ref,
                     o_ref, *, out_valid):
    # Layer 1: (tm, 896) @ (896, 384) -> f32 acc, bias add + ReLU in f32.
    x = x_ref[...].astype(jnp.bfloat16)
    h = jnp.dot(x, w1_ref[...], preferred_element_type=jnp.float32) + b1_ref[...]
    h = jnp.maximum(h, 0.0)

    # Layer 2: (tm, 384) @ (384, 128)
    h = jnp.dot(h.astype(jnp.bfloat16), w2_ref[...],
                preferred_element_type=jnp.float32) + b2_ref[...]
    h = jnp.maximum(h, 0.0)

    # Layer 3 (output): (tm, 128) @ (128, 128)
    logits = jnp.dot(h.astype(jnp.bfloat16), w3_ref[...],
                     preferred_element_type=jnp.float32) + b3_ref[...]

    # Mask padded output lanes so they don't corrupt the log-softmax normalizer.
    lane = jax.lax.broadcasted_iota(jnp.int32, logits.shape, dimension=1)
    logits = jnp.where(lane < out_valid, logits, jnp.float32(-1e30))

    # Numerically stable log_softmax along lanes (exp/log -> EUP, reduces -> XLU).
    m = jnp.max(logits, axis=-1, keepdims=True)
    s = logits - m
    lse = jnp.log(jnp.sum(jnp.exp(s), axis=-1, keepdims=True))
    o_ref[...] = s - lse


# ---------------------------------------------------------------------------
# Parameter init (padded, weights in bf16, biases in f32)
# ---------------------------------------------------------------------------
def init_params(key, input_dim=28 * 28, output_dim=10, hidden=(300, 100)):
    """Mimics torch.nn.Linear's U(-1/sqrt(fan_in), 1/sqrt(fan_in)) init.

    Returns a list of (W_padded_bf16 (in_pad, out_pad), b_padded_f32 (1, out_pad)).
    Padding rows/cols are zero, so padded hidden lanes stay exactly zero through ReLU.
    """
    dims = [input_dim, *hidden, output_dim]
    layers = []
    for i in range(len(dims) - 1):
        fan_in, fan_out = dims[i], dims[i + 1]
        in_pad, out_pad = _round_up(fan_in, LANE), _round_up(fan_out, LANE)
        key, kw, kb = jax.random.split(key, 3)
        bound = 1.0 / math.sqrt(fan_in)
        w = jax.random.uniform(kw, (fan_in, fan_out), jnp.float32, -bound, bound)
        b = jax.random.uniform(kb, (1, fan_out), jnp.float32, -bound, bound)
        w_pad = jnp.zeros((in_pad, out_pad), jnp.float32).at[:fan_in, :fan_out].set(w)
        b_pad = jnp.zeros((1, out_pad), jnp.float32).at[:, :fan_out].set(b)
        layers.append((w_pad.astype(jnp.bfloat16), b_pad))
    return layers


# ---------------------------------------------------------------------------
# Forward pass wrapper
# ---------------------------------------------------------------------------
@functools.partial(jax.jit, static_argnames=("output_dim",))
def fc_model_forward(x, layers, output_dim):
    (w1, b1), (w2, b2), (w3, b3) = layers
    batch, d_in = x.shape
    d_in_pad = w1.shape[0]
    h1_pad, h2_pad, out_pad = w1.shape[1], w2.shape[1], w3.shape[1]

    # Batch tiling: single tile for small batches, 256-row tiles otherwise.
    pb8 = _round_up(batch, SUBLANE)
    if pb8 <= MAX_BATCH_TILE:
        tm = pb8
        padded_batch = pb8
    else:
        tm = MAX_BATCH_TILE
        padded_batch = _round_up(batch, tm)

    x_p = jnp.pad(x, ((0, padded_batch - batch), (0, d_in_pad - d_in)))

    kernel = functools.partial(_fc_fused_kernel, out_valid=output_dim)
    out = pl.pallas_call(
        kernel,
        out_shape=jax.ShapeDtypeStruct((padded_batch, out_pad), jnp.float32),
        grid_spec=pltpu.PrefetchScalarGridSpec(
            num_scalar_prefetch=0,
            grid=(padded_batch // tm,),
            in_specs=[
                pl.BlockSpec((tm, d_in_pad), lambda i: (i, 0)),      # x tile
                pl.BlockSpec((d_in_pad, h1_pad), lambda i: (0, 0)),  # W1 (resident)
                pl.BlockSpec((1, h1_pad), lambda i: (0, 0)),         # b1
                pl.BlockSpec((h1_pad, h2_pad), lambda i: (0, 0)),    # W2 (resident)
                pl.BlockSpec((1, h2_pad), lambda i: (0, 0)),         # b2
                pl.BlockSpec((h2_pad, out_pad), lambda i: (0, 0)),   # W3 (resident)
                pl.BlockSpec((1, out_pad), lambda i: (0, 0)),        # b3
            ],
            out_specs=pl.BlockSpec((tm, out_pad), lambda i: (i, 0)),
        ),
        compiler_params=pltpu.CompilerParams(
            dimension_semantics=("parallel",)),
    )(x_p, w1, b1, w2, b2, w3, b3)

    return out[:batch, :output_dim]


# ---------------------------------------------------------------------------
# Pure-JAX reference (same padded bf16-weight math) for correctness check
# ---------------------------------------------------------------------------
def fc_model_ref(x, layers, output_dim):
    d_in_pad = layers[0][0].shape[0]
    y = jnp.pad(x, ((0, 0), (0, d_in_pad - x.shape[1])))
    for i, (w, b) in enumerate(layers):
        y = jnp.dot(y.astype(jnp.bfloat16), w,
                    preferred_element_type=jnp.float32) + b
        if i < len(layers) - 1:
            y = jnp.maximum(y, 0.0)
    y = y[:, :output_dim]
    return jax.nn.log_softmax(y, axis=1)


if __name__ == "__main__":
    key = jax.random.PRNGKey(0)
    k_params, k_x = jax.random.split(key)

    input_dim, output_dim, hidden = 28 * 28, 10, (300, 100)
    batch = 8

    layers = init_params(k_params, input_dim, output_dim, hidden)
    x = jax.random.normal(k_x, (batch, input_dim), jnp.float32)

    out = fc_model_forward(x, layers, output_dim=output_dim)
    out = jax.block_until_ready(out)

    ref = fc_model_ref(x, layers, output_dim)
    assert out.shape == (batch, output_dim)
    assert jnp.allclose(out, ref, atol=2e-2, rtol=2e-2), "mismatch vs reference"
    # log_softmax rows should exponentiate-sum to ~1
    assert jnp.allclose(jnp.sum(jnp.exp(out), axis=1), 1.0, atol=1e-3)

    print("KERNEL_OK")
</pallas_src>

<mosaic_0001>
module attributes {stable_mosaic.version = 11 : i64} {
  func.func @_fc_fused_kernel(%arg0: i32, %arg1: memref<8x896xf32, #tpu.memory_space<vmem>>, %arg2: memref<896x384xbf16, #tpu.memory_space<vmem>>, %arg3: memref<1x384xf32, #tpu.memory_space<vmem>>, %arg4: memref<384x128xbf16, #tpu.memory_space<vmem>>, %arg5: memref<1x128xf32, #tpu.memory_space<vmem>>, %arg6: memref<128x128xbf16, #tpu.memory_space<vmem>>, %arg7: memref<1x128xf32, #tpu.memory_space<vmem>>, %arg8: memref<8x128xf32, #tpu.memory_space<vmem>>) attributes {dimension_semantics = [#tpu.dimension_semantics<parallel>], iteration_bounds = array<i64: 1>, scalar_prefetch = 0 : i64, scratch_operands = 0 : i64, tpu.core_type = #tpu.core_type<tc>, window_params = [{transform_indices = @transform_0, window_bounds = array<i64: 8, 896>}, {pipeline_mode = #tpu.pipeline_mode<synchronous>, transform_indices = @transform_1, window_bounds = array<i64: 896, 384>}, {pipeline_mode = #tpu.pipeline_mode<synchronous>, transform_indices = @transform_2, window_bounds = array<i64: 1, 384>}, {pipeline_mode = #tpu.pipeline_mode<synchronous>, transform_indices = @transform_3, window_bounds = array<i64: 384, 128>}, {pipeline_mode = #tpu.pipeline_mode<synchronous>, transform_indices = @transform_4, window_bounds = array<i64: 1, 128>}, {pipeline_mode = #tpu.pipeline_mode<synchronous>, transform_indices = @transform_5, window_bounds = array<i64: 128, 128>}, {pipeline_mode = #tpu.pipeline_mode<synchronous>, transform_indices = @transform_6, window_bounds = array<i64: 1, 128>}, {transform_indices = @transform_7, window_bounds = array<i64: 8, 128>}]} {
    %c0 = arith.constant 0 : index
    %c0_0 = arith.constant 0 : index
    %0 = vector.load %arg1[%c0, %c0_0] : memref<8x896xf32, #tpu.memory_space<vmem>>, vector<8x896xf32>
    %1 = arith.truncf %0 : vector<8x896xf32> to vector<8x896xbf16>
    %c0_1 = arith.constant 0 : index
    %c0_2 = arith.constant 0 : index
    %2 = vector.load %arg2[%c0_1, %c0_2] : memref<896x384xbf16, #tpu.memory_space<vmem>>, vector<896x384xbf16>
    %cst = arith.constant dense<0.000000e+00> : vector<8x384xf32>
    %3 = tpu.matmul %1, %2, %cst {dimension_numbers = #tpu.dot_dimension_numbers<[1], [0], [0], [1], [0, 0, 1, 1], [], []>} : vector<8x896xbf16>, vector<896x384xbf16>, vector<8x384xf32> -> vector<8x384xf32>
    %c0_3 = arith.constant 0 : index
    %c0_4 = arith.constant 0 : index
    %4 = vector.load %arg3[%c0_3, %c0_4] : memref<1x384xf32, #tpu.memory_space<vmem>>, vector<1x384xf32>
    %5 = vector.broadcast %4 : vector<1x384xf32> to vector<8x384xf32>
    %6 = arith.addf %3, %5 : vector<8x384xf32>
    %cst_5 = arith.constant 0.000000e+00 : f32
    %7 = vector.broadcast %cst_5 : f32 to vector<8x384xf32>
    %8 = arith.maximumf %6, %7 : vector<8x384xf32>
    %9 = arith.truncf %8 : vector<8x384xf32> to vector<8x384xbf16>
    %c0_6 = arith.constant 0 : index
    %c0_7 = arith.constant 0 : index
    %10 = vector.load %arg4[%c0_6, %c0_7] : memref<384x128xbf16, #tpu.memory_space<vmem>>, vector<384x128xbf16>
    %cst_8 = arith.constant dense<0.000000e+00> : vector<8x128xf32>
    %11 = tpu.matmul %9, %10, %cst_8 {dimension_numbers = #tpu.dot_dimension_numbers<[1], [0], [0], [1], [0, 0, 1, 1], [], []>} : vector<8x384xbf16>, vector<384x128xbf16>, vector<8x128xf32> -> vector<8x128xf32>
    %c0_9 = arith.constant 0 : index
    %c0_10 = arith.constant 0 : index
    %12 = vector.load %arg5[%c0_9, %c0_10] : memref<1x128xf32, #tpu.memory_space<vmem>>, vector<1x128xf32>
    %13 = vector.broadcast %12 : vector<1x128xf32> to vector<8x128xf32>
    %14 = arith.addf %11, %13 : vector<8x128xf32>
    %cst_11 = arith.constant 0.000000e+00 : f32
    %15 = vector.broadcast %cst_11 : f32 to vector<8x128xf32>
    %16 = arith.maximumf %14, %15 : vector<8x128xf32>
    %17 = arith.truncf %16 : vector<8x128xf32> to vector<8x128xbf16>
    %c0_12 = arith.constant 0 : index
    %c0_13 = arith.constant 0 : index
    %18 = vector.load %arg6[%c0_12, %c0_13] : memref<128x128xbf16, #tpu.memory_space<vmem>>, vector<128x128xbf16>
    %cst_14 = arith.constant dense<0.000000e+00> : vector<8x128xf32>
    %19 = tpu.matmul %17, %18, %cst_14 {dimension_numbers = #tpu.dot_dimension_numbers<[1], [0], [0], [1], [0, 0, 1, 1], [], []>} : vector<8x128xbf16>, vector<128x128xbf16>, vector<8x128xf32> -> vector<8x128xf32>
    %c0_15 = arith.constant 0 : index
    %c0_16 = arith.constant 0 : index
    %20 = vector.load %arg7[%c0_15, %c0_16] : memref<1x128xf32, #tpu.memory_space<vmem>>, vector<1x128xf32>
    %21 = vector.broadcast %20 : vector<1x128xf32> to vector<8x128xf32>
    %22 = arith.addf %19, %21 : vector<8x128xf32>
    %23 = tpu.iota {dimensions = array<i32: 1>} : vector<8x128xi32>
    %c10_i32 = arith.constant 10 : i32
    %24 = vector.broadcast %c10_i32 : i32 to vector<8x128xi32>
    %25 = arith.cmpi slt, %23, %24 : vector<8x128xi32>
    %cst_17 = arith.constant -1.000000e+30 : f32
    %26 = vector.broadcast %cst_17 : f32 to vector<8x128xf32>
    %27 = arith.select %25, %22, %26 : vector<8x128xi1>, vector<8x128xf32>
    %cst_18 = arith.constant dense<0xFF800000> : vector<8xf32>
    %28 = vector.multi_reduction <maximumf>, %27, %cst_18 [1] : vector<8x128xf32> to vector<8xf32>
    %29 = vector.shape_cast %28 : vector<8xf32> to vector<8x1xf32>
    %30 = vector.broadcast %29 : vector<8x1xf32> to vector<8x128xf32>
    %31 = arith.subf %27, %30 : vector<8x128xf32>
    %32 = math.exp %31 : vector<8x128xf32>
    %cst_19 = arith.constant dense<0.000000e+00> : vector<8xf32>
    %33 = vector.multi_reduction <add>, %32, %cst_19 [1] : vector<8x128xf32> to vector<8xf32>
    %34 = vector.shape_cast %33 : vector<8xf32> to vector<8x1xf32>
    %35 = math.log %34 : vector<8x1xf32>
    %36 = vector.broadcast %35 : vector<8x1xf32> to vector<8x128xf32>
    %37 = arith.subf %31, %36 : vector<8x128xf32>
    %c0_20 = arith.constant 0 : index
    %c0_21 = arith.constant 0 : index
    %38 = vector.load %arg8[%c0_20, %c0_21] : memref<8x128xf32, #tpu.memory_space<vmem>>, vector<8x128xf32>
    tpu.vector_store %arg8[%c0_20, %c0_21], %37 {strides = array<i32>} : memref<8x128xf32, #tpu.memory_space<vmem>>, vector<8x128xf32>,
    return
  }
  func.func @transform_0(%arg0: i32) -> (i32, i32) {
    %c0_i32 = arith.constant 0 : i32
    %c0_i32_0 = arith.constant 0 : i32
    return %arg0, %c0_i32 : i32, i32
  }
  func.func @transform_1(%arg0: i32) -> (i32, i32) {
    %c0_i32 = arith.constant 0 : i32
    %c0_i32_0 = arith.constant 0 : i32
    %c0_i32_1 = arith.constant 0 : i32
    return %c0_i32, %c0_i32_0 : i32, i32
  }
  func.func @transform_2(%arg0: i32) -> (i32, i32) {
    %c0_i32 = arith.constant 0 : i32
    %c0_i32_0 = arith.constant 0 : i32
    %c0_i32_1 = arith.constant 0 : i32
    return %c0_i32, %c0_i32_0 : i32, i32
  }
  func.func @transform_3(%arg0: i32) -> (i32, i32) {
    %c0_i32 = arith.constant 0 : i32
    %c0_i32_0 = arith.constant 0 : i32
    %c0_i32_1 = arith.constant 0 : i32
    return %c0_i32, %c0_i32_0 : i32, i32
  }
  func.func @transform_4(%arg0: i32) -> (i32, i32) {
    %c0_i32 = arith.constant 0 : i32
    %c0_i32_0 = arith.constant 0 : i32
    %c0_i32_1 = arith.constant 0 : i32
    return %c0_i32, %c0_i32_0 : i32, i32
  }
  func.func @transform_5(%arg0: i32) -> (i32, i32) {
    %c0_i32 = arith.constant 0 : i32
    %c0_i32_0 = arith.constant 0 : i32
    %c0_i32_1 = arith.constant 0 : i32
    return %c0_i32, %c0_i32_0 : i32, i32
  }
  func.func @transform_6(%arg0: i32) -> (i32, i32) {
    %c0_i32 = arith.constant 0 : i32
    %c0_i32_0 = arith.constant 0 : i32
    %c0_i32_1 = arith.constant 0 : i32
    return %c0_i32, %c0_i32_0 : i32, i32
  }
  func.func @transform_7(%arg0: i32) -> (i32, i32) {
    %c0_i32 = arith.constant 0 : i32
    %c0_i32_0 = arith.constant 0 : i32
    return %arg0, %c0_i32 : i32, i32
  }
}

</mosaic_0001>

<bundles_post_ra>
// kernel: fc_model_forward.1
= control target key start
LH: loop header
LB: loop body
LE: loop exit
PB: predicated region body
PF: predicated region fallthrough
CT: control target
= control target key end

     0   :  { %12 = vsyncpa [#allocation3], 0  ;;  %s2846_s0 = inlined_call_operand.vmem [shape: f32[8,896], index: 0, kind: input, shape index: {}]   ;;  %s2847_s1 = inlined_call_operand.hbm [shape: bf16[896,384], index: 1, kind: input, shape index: {}]   ;;  %s2848_s2 = inlined_call_operand.vmem [shape: f32[1,384], index: 2, kind: input, shape index: {}]   ;;  %s2849_s3 = inlined_call_operand.hbm [shape: bf16[384,128], index: 3, kind: input, shape index: {}]   ;;  %s2850_s4 = inlined_call_operand.vmem [shape: f32[1,128], index: 4, kind: input, shape index: {}]   ;;  %s2851_s5 = inlined_call_operand.vmem [shape: bf16[128,128], index: 5, kind: input, shape index: {}]   ;;  %s2852_s6 = inlined_call_operand.vmem [shape: f32[1,128], index: 6, kind: input, shape index: {}]   ;;  %s2853_s7 = inlined_call_operand.hbm [shape: f32[8,128], index: 7, kind: output, shape index: {}]  }
   0x1   :  { %13 = vsyncpa [#allocation6], 0 }
   0x2   :  { %14 = vsyncpa [#allocation4], 0  ;;  %s2673_s24 = smov [#allocation2]  }
   0x3   :  { %s22_s25 = sshll.u32 %s2673_s24, 4  ;;  %s23_s25 = int_to_ptr.vmem [resolvable:$true] %s22_s25 }
   0x4   :  { %s2615_s26 = scalar_lea.vmem %s23_s25, 21504  ;;  %p2620_p1 = scmp.lt.s32.totalorder %s23_s25, %s23_s25 }
   0x5   :  { %p2616_p0 = scmp.ne.s32.totalorder %s23_s25, %s2615_s26  ;;  %p2621_p2 = scmp.lt.s32.totalorder %s2615_s26, %s2615_s26 }
   0x7   :  { %p2622_p3 = por %p2621_p2, %p2620_p1 }
   0x9   :  { %p2623_p4 = pnand %p2622_p3, %p2616_p0 }
   0xb   :  { %2626 = shalt.err (!%p2623_p4)
}
   0xc   :  { %s2674_s27 = smov 192   ;;  %s2675_s28 = smov 12  }
   0xd   :  { %28 = dma.hbm_to_vmem [thread:$0]  %s2847_s1, 21504, %s23_s25, [#allocation3], %s2674_s27, %s2674_s27, %s2675_s28  }
   0xe   :  { %s2676_s8 = smov [#allocation5]  }
   0xf   :  { %s36_s9 = sshll.u32 %s2676_s8, 4  ;;  %s37_s9 = int_to_ptr.vmem [resolvable:$true] %s36_s9 }
  0x10   :  { %s2635_s10 = scalar_lea.vmem %s37_s9, 3072  ;;  %p2640_p6 = scmp.lt.s32.totalorder %s37_s9, %s37_s9 }
  0x11   :  { %p2636_p5 = scmp.ne.s32.totalorder %s37_s9, %s2635_s10  ;;  %p2641_p7 = scmp.lt.s32.totalorder %s2635_s10, %s2635_s10 }
  0x13   :  { %p2642_p8 = por %p2641_p7, %p2640_p6 }
  0x15   :  { %p2643_p9 = pnand %p2642_p8, %p2636_p5 }
  0x17   :  { %2646 = shalt.err (!%p2643_p9)
}
  0x18   :  { %s2677_s11 = smov 64   ;;  %s2678_s12 = smov 4  }
  0x19   :  { %42 = dma.hbm_to_vmem [thread:$0]  %s2849_s3, 3072, %s37_s9, [#allocation6], %s2677_s11, %s2677_s11, %s2678_s12  }
  0x1a   :  { %2667 = dma.done.wait [#allocation3], 21504  }
  0x1b   :  { %2668 = vsyncadd [#allocation3], 4294945792 }
  0x1c   :  { %2669 = dma.done.wait [#allocation6], 3072  }
  0x1d   :  { %2670 = vsyncadd [#allocation6], 4294964224  ;;  %v2347_v0 = vld [vmem:[#allocation2 + $0xac] ss:$12 sps:$4 sm:$0xff]   ;;  %v2349_v1 = vld [vmem:[#allocation2 + $0xa8] ss:$12 sps:$4 sm:$0xff]  }
  0x1e   :  { %1207 = vmatprep.subr.bf16.mxu0 %v2347_v0  ;;  %v2350_v2 = vld [vmem:[#allocation2 + $0x22c] ss:$12 sps:$4 sm:$0xff]   ;;  %v2352_v3 = vld [vmem:[#allocation2 + $0x228] ss:$12 sps:$4 sm:$0xff]   ;;  %v2355_v5 = vld [vmem:[#allocation2 + $0x90] ss:$12 sps:$4 sm:$0xff]  }
  0x1f   :  { %1208 = vmatpush1.bf16.msra.mxu0 %v2349_v1  ;;  %v2353_v4 = vld [vmem:[#allocation2 + $0x94] ss:$12 sps:$4 sm:$0xff]   ;;  %1248 = vmatprep.subr.bf16.mxu1 %v2350_v2  ;;  %v2358_v7 = vld [vmem:[#allocation2 + $0x210] ss:$12 sps:$4 sm:$0xff]   ;;  %v2361_v9 = vld [vmem:[#allocation2 + $0x78] ss:$12 sps:$4 sm:$0xff]  }
  0x20   :  { %v2356_v6 = vld [vmem:[#allocation2 + $0x214] ss:$12 sps:$4 sm:$0xff]   ;;  %1249 = vmatpush1.bf16.msra.mxu1 %v2352_v3  ;;  %1209 = vmatprep.subr.bf16.mxu0 %v2353_v4  ;;  %v2359_v8 = vld [vmem:[#allocation2 + $0x7c] ss:$12 sps:$4 sm:$0xff]   ;;  %v2365_v11 = vld [vmem:[#allocation2 + $0x64] ss:$12 sps:$4 sm:$0xff]  }
  0x21   :  { %1250 = vmatprep.subr.bf16.mxu1 %v2356_v6  ;;  %v2362_v10 = vld [vmem:[#allocation2 + $0x1fc] ss:$12 sps:$4 sm:$0xff]   ;;  %v2364_v12 = vld [vmem:[#allocation2 + $0x1f8] ss:$12 sps:$4 sm:$0xff]   ;;  %v2367_v14 = vld [vmem:[#allocation2 + $0x60] ss:$12 sps:$4 sm:$0xff]  }
  0x22   :  { %v2368_v13 = vld [vmem:[#allocation2 + $0x1e4] ss:$12 sps:$4 sm:$0xff]   ;;  %v2371_v15 = vld [vmem:[#allocation2 + $0x4c] ss:$12 sps:$4 sm:$0xff]   ;;  %v2373_v18 = vld [vmem:[#allocation2 + $0x48] ss:$12 sps:$4 sm:$0xff]  }
  0x23   :  { %1210 = vmatpush1.bf16.msra.mxu0 %v2355_v5  ;;  %v2370_v16 = vld [vmem:[#allocation2 + $0x1e0] ss:$12 sps:$4 sm:$0xff]   ;;  %v2376_v20 = vld [vmem:[#allocation2 + $0x1c8] ss:$12 sps:$4 sm:$0xff]   ;;  %v2379_v22 = vld [vmem:[#allocation2 + $0x30] ss:$12 sps:$4 sm:$0xff]  }
  0x24   :  { %1211 = vmatprep.subr.bf16.mxu0 %v2359_v8  ;;  %1251 = vmatpush1.bf16.msra.mxu1 %v2358_v7  ;;  %v2374_v17 = vld [vmem:[#allocation2 + $0x1cc] ss:$12 sps:$4 sm:$0xff]   ;;  %v2377_v19 = vld [vmem:[#allocation2 + $0x34] ss:$12 sps:$4 sm:$0xff]   ;;  %v2383_v23 = vld [vmem:[#allocation2 + $0x1c] ss:$12 sps:$4 sm:$0xff]  }
  0x25   :  { %1252 = vmatprep.subr.bf16.mxu1 %v2362_v10  ;;  %v2380_v21 = vld [vmem:[#allocation2 + $0x1b4] ss:$12 sps:$4 sm:$0xff]   ;;  %v2382_v24 = vld [vmem:[#allocation2 + $0x1b0] ss:$12 sps:$4 sm:$0xff]   ;;  %v2385_v26 = vld [vmem:[#allocation2 + $0x18] ss:$12 sps:$4 sm:$0xff]  }
  0x26   :  { %v2386_v25 = vld [vmem:[#allocation2 + $0x19c] ss:$12 sps:$4 sm:$0xff]   ;;  %v2389_v27 = vld [vmem:[#allocation2 + $0x4] ss:$12 sps:$4 sm:$0xff]   ;;  %v2391_v30 = vld [vmem:[#allocation2] ss:$12 sps:$4 sm:$0xff]  }
  0x27   :  { %1212 = vmatpush1.bf16.msra.mxu0 %v2361_v9  ;;  %v2388_v28 = vld [vmem:[#allocation2 + $0x198] ss:$12 sps:$4 sm:$0xff]   ;;  %v2394_v32 = vld [vmem:[#allocation2 + $0x180] ss:$12 sps:$4 sm:$0xff]   ;;  %v2397_v34 = vld [vmem:[#allocation2 + $0x168] ss:$12 sps:$4 sm:$0xff]  }
  0x28   :  { %1213 = vmatprep.subr.bf16.mxu0 %v2365_v11  ;;  %1253 = vmatpush1.bf16.msra.mxu1 %v2364_v12  ;;  %v2392_v29 = vld [vmem:[#allocation2 + $0x184] ss:$12 sps:$4 sm:$0xff]   ;;  %v2395_v31 = vld [vmem:[#allocation2 + $0x16c] ss:$12 sps:$4 sm:$0xff]   ;;  %v2401_v35 = vld [vmem:[#allocation2 + $0x154] ss:$12 sps:$4 sm:$0xff]  }
  0x29   :  { %1254 = vmatprep.subr.bf16.mxu1 %v2368_v13  ;;  %v2398_v33 = vld [vmem:[#allocation2 + $0x2ec] ss:$12 sps:$4 sm:$0xff]   ;;  %v2400_v36 = vld [vmem:[#allocation2 + $0x2e8] ss:$12 sps:$4 sm:$0xff]   ;;  %v2403_v38 = vld [vmem:[#allocation2 + $0x150] ss:$12 sps:$4 sm:$0xff]  }
  0x2a   :  { %v2404_v37 = vld [vmem:[#allocation2 + $0x2d4] ss:$12 sps:$4 sm:$0xff]   ;;  %v2407_v39 = vld [vmem:[#allocation2 + $0x13c] ss:$12 sps:$4 sm:$0xff]   ;;  %v2409_v42 = vld [vmem:[#allocation2 + $0x138] ss:$12 sps:$4 sm:$0xff]  }
  0x2b   :  { %1214 = vmatpush1.bf16.msra.mxu0 %v2367_v14  ;;  %v2406_v40 = vld [vmem:[#allocation2 + $0x2d0] ss:$12 sps:$4 sm:$0xff]   ;;  %v2412_v44 = vld [vmem:[#allocation2 + $0x2b8] ss:$12 sps:$4 sm:$0xff]   ;;  %v57_v46 = vld [vmem:[%s2846_s0 + $0x8] sm:$0xff]  ;;  %vm2681_vm0 = vmmov 0  }
  0x2c   :  { %1215 = vmatprep.subr.bf16.mxu0 %v2371_v15  ;;  %1255 = vmatpush1.bf16.msra.mxu1 %v2370_v16  ;;  %v2410_v41 = vld [vmem:[#allocation2 + $0x2bc] ss:$12 sps:$4 sm:$0xff]   ;;  %v2413_v43 = vld [vmem:[#allocation2 + $0x124] ss:$12 sps:$4 sm:$0xff]   ;;  %v2415_v47 = vld [vmem:[#allocation2 + $0x120] ss:$12 sps:$4 sm:$0xff]   ;;  %v2732_v48 = vpack.c.bf16 %v57_v46, %v57_v46 }
  0x2d   :  { %1256 = vmatprep.subr.bf16.mxu1 %v2374_v17  ;;  %v2416_v45 = vld [vmem:[#allocation2 + $0x2a4] ss:$12 sps:$4 sm:$0xff]   ;;  %v2419_v49 = vld [vmem:[#allocation2 + $0x10c] ss:$12 sps:$4 sm:$0xff]   ;;  %v2421_v54 = vld [vmem:[#allocation2 + $0x108] ss:$12 sps:$4 sm:$0xff]  }
  0x2e   :  { %v59_v50 = vld [vmem:[%s2846_s0 + $0x18] sm:$0xff]  ;;  %v2418_v51 = vld [vmem:[#allocation2 + $0x2a0] ss:$12 sps:$4 sm:$0xff]   ;;  %1239 = vmatprep.mubr.bf16.mxu0 %v2732_v48  ;;  %v2424_v56 = vld [vmem:[#allocation2 + $0x288] ss:$12 sps:$4 sm:$0xff]   ;;  %v2679_v17 = vmov 0  }
  0x2f   :  { %1216 = vmatpush1.bf16.msra.mxu0 %v2373_v18  ;;  %v2738_v52 = vpack.c.bf16 %v59_v50, %v59_v50  ;;  %v2422_v53 = vld [vmem:[#allocation2 + $0x28c] ss:$12 sps:$4 sm:$0xff]   ;;  %v2425_v55 = vld [vmem:[#allocation2 + $0xf4] ss:$12 sps:$4 sm:$0xff]   ;;  %v2427_v58 = vld [vmem:[#allocation2 + $0xf0] ss:$12 sps:$4 sm:$0xff]  }
  0x30   :  { %1217 = vmatprep.subr.bf16.mxu0 %v2377_v19  ;;  %1257 = vmatpush1.bf16.msra.mxu1 %v2376_v20  ;;  %v2428_v57 = vld [vmem:[#allocation2 + $0x274] ss:$12 sps:$4 sm:$0xff]   ;;  %v2431_v59 = vld [vmem:[#allocation2 + $0xdc] ss:$12 sps:$4 sm:$0xff]   ;;  %v2433_v62 = vld [vmem:[#allocation2 + $0xd8] ss:$12 sps:$4 sm:$0xff]  }
  0x31   :  { %1258 = vmatprep.subr.bf16.mxu1 %v2380_v21  ;;  %1280 = vmatprep.mubr.bf16.mxu1 %v2738_v52  ;;  %v2430_v60 = vld [vmem:[#allocation2 + $0x270] ss:$12 sps:$4 sm:$0xff]   ;;  %v2436_v0 = vld [vmem:[#allocation2 + $0x258] ss:$12 sps:$4 sm:$0xff]   ;;  %v2439_v1 = vld [vmem:[#allocation2 + $0xc0] ss:$12 sps:$4 sm:$0xff]  }
  0x32   :  { %v2434_v61 = vld [vmem:[#allocation2 + $0x25c] ss:$12 sps:$4 sm:$0xff]   ;;  %v2437_v63 = vld [vmem:[#allocation2 + $0xc4] ss:$12 sps:$4 sm:$0xff]   ;;  %v2442_v3 = vld [vmem:[#allocation2 + $0x240] ss:$12 sps:$4 sm:$0xff]  }
  0x33   :  { %1218 = vmatpush1.bf16.msra.mxu0 %v2379_v22  ;;  %v2440_v2 = vld [vmem:[#allocation2 + $0x244] ss:$12 sps:$4 sm:$0xff]   ;;  %v2445_v5 = vld [vmem:[#allocation2 + $0x3ac] ss:$12 sps:$4 sm:$0xff]   ;;  %v2443_v9 = vld [vmem:[#allocation2 + $0x3a8] ss:$12 sps:$4 sm:$0xff]  }
  0x34   :  { %1219 = vmatprep.subr.bf16.mxu0 %v2383_v23  ;;  %1259 = vmatpush1.bf16.msra.mxu1 %v2382_v24  ;;  %v56_v4 = vld [vmem:[%s2846_s0] sm:$0xff]  ;;  %v58_v6 = vld [vmem:[%s2846_s0 + $0x10] sm:$0xff]  ;;  %v2448_v8 = vld [vmem:[#allocation2 + $0x52c] ss:$12 sps:$4 sm:$0xff]  }
  0x35   :  { %1260 = vmatprep.subr.bf16.mxu1 %v2386_v25  ;;  %v2747_v7 = vpack.c.bf16 %v56_v4, %v56_v4  ;;  %v2749_v10 = vpack.c.bf16 %v58_v6, %v58_v6  ;;  %v2451_v11 = vld [vmem:[#allocation2 + $0x394] ss:$12 sps:$4 sm:$0xff]   ;;  %v2449_v14 = vld [vmem:[#allocation2 + $0x390] ss:$12 sps:$4 sm:$0xff]   ;;  %v2455_v19 = vld [vmem:[#allocation2 + $0x378] ss:$12 sps:$4 sm:$0xff]  }
  0x36   :  { %v2446_v12 = vld [vmem:[#allocation2 + $0x528] ss:$12 sps:$4 sm:$0xff]   ;;  %v2452_v16 = vld [vmem:[#allocation2 + $0x510] ss:$12 sps:$4 sm:$0xff]   ;;  %v2458_v21 = vld [vmem:[#allocation2 + $0x4f8] ss:$12 sps:$4 sm:$0xff]  }
  0x37   :  { %1220 = vmatpush1.bf16.msra.mxu0 %v2385_v26  ;;  %v2454_v13 = vld [vmem:[#allocation2 + $0x514] ss:$12 sps:$4 sm:$0xff]   ;;  %v2457_v15 = vld [vmem:[#allocation2 + $0x37c] ss:$12 sps:$4 sm:$0xff]   ;;  %v2463_v20 = vld [vmem:[#allocation2 + $0x364] ss:$12 sps:$4 sm:$0xff]  }
  0x38   :  { %1221 = vmatprep.subr.bf16.mxu0 %v2389_v27  ;;  %1261 = vmatpush1.bf16.msra.mxu1 %v2388_v28  ;;  %v2460_v18 = vld [vmem:[#allocation2 + $0x4fc] ss:$12 sps:$4 sm:$0xff]   ;;  %v2466_v22 = vld [vmem:[#allocation2 + $0x4e4] ss:$12 sps:$4 sm:$0xff]   ;;  %v2461_v23 = vld [vmem:[#allocation2 + $0x360] ss:$12 sps:$4 sm:$0xff]  }
  0x39   :  { %1262 = vmatprep.subr.bf16.mxu1 %v2392_v29  ;;  %v2469_v24 = vld [vmem:[#allocation2 + $0x34c] ss:$12 sps:$4 sm:$0xff]   ;;  %v2467_v27 = vld [vmem:[#allocation2 + $0x348] ss:$12 sps:$4 sm:$0xff]   ;;  %v2494_v46 = vld [vmem:[#allocation2 + $0x170] ss:$12 sps:$4 sm:$0xff]  }
  0x3a   :  { %v2464_v25 = vld [vmem:[#allocation2 + $0x4e0] ss:$12 sps:$4 sm:$0xff]   ;;  %v2470_v29 = vld [vmem:[#allocation2 + $0x4c8] ss:$12 sps:$4 sm:$0xff]   ;;  %v2519_v4 = vld [vmem:[#allocation2 + $0xf8] ss:$12 sps:$4 sm:$0xff]  }
  0x3b   :  { %1222 = vmatpush1.bf16.msra.mxu0 %v2391_v30  ;;  %v2472_v26 = vld [vmem:[#allocation2 + $0x4cc] ss:$12 sps:$4 sm:$0xff]   ;;  %v2475_v28 = vld [vmem:[#allocation2 + $0x334] ss:$12 sps:$4 sm:$0xff]   ;;  %v2523_v6 = vld [vmem:[#allocation2 + $0x3dc] ss:$12 sps:$4 sm:$0xff]  }
  0x3c   :  { %1223 = vmatprep.subr.bf16.mxu0 %v2395_v31  ;;  %1263 = vmatpush1.bf16.msra.mxu1 %v2394_v32  ;;  %v2478_v30 = vld [vmem:[#allocation2 + $0x4b4] ss:$12 sps:$4 sm:$0xff]   ;;  %v2473_v31 = vld [vmem:[#allocation2 + $0x330] ss:$12 sps:$4 sm:$0xff]  }
  0x3d   :  { %1264 = vmatprep.subr.bf16.mxu1 %v2398_v33  ;;  %v2481_v32 = vld [vmem:[#allocation2 + $0x31c] ss:$12 sps:$4 sm:$0xff]   ;;  %v2498_v50 = vld [vmem:[#allocation2 + $0x454] ss:$12 sps:$4 sm:$0xff]  }
  0x3e   :  { %v2476_v33 = vld [vmem:[#allocation2 + $0x4b0] ss:$12 sps:$4 sm:$0xff]  }
  0x3f   :  { %1224 = vmatpush2.bf16.msra.mxu0 %v2397_v34  ;;  %v2484_v34 = vld [vmem:[#allocation2 + $0x49c] ss:$12 sps:$4 sm:$0xff]  }
  0x40   :  { %1225 = vmatprep.subr.bf16.mxu0 %v2401_v35  ;;  %1265 = vmatpush2.bf16.msra.mxu1 %v2400_v36  ;;  %v2479_v35 = vld [vmem:[#allocation2 + $0x318] ss:$12 sps:$4 sm:$0xff]  }
  0x41   :  { %1266 = vmatprep.subr.bf16.mxu1 %v2404_v37  ;;  %v2487_v36 = vld [vmem:[#allocation2 + $0x304] ss:$12 sps:$4 sm:$0xff]  }
  0x42   :  { %v2482_v37 = vld [vmem:[#allocation2 + $0x498] ss:$12 sps:$4 sm:$0xff]  }
  0x43   :  { %1226 = vmatpush2.bf16.msra.mxu0 %v2403_v38  ;;  %v2490_v38 = vld [vmem:[#allocation2 + $0x484] ss:$12 sps:$4 sm:$0xff]  }
  0x44   :  { %1227 = vmatprep.subr.bf16.mxu0 %v2407_v39  ;;  %1267 = vmatpush2.bf16.msra.mxu1 %v2406_v40  ;;  %v2485_v39 = vld [vmem:[#allocation2 + $0x300] ss:$12 sps:$4 sm:$0xff]  }
  0x45   :  { %1268 = vmatprep.subr.bf16.mxu1 %v2410_v41  ;;  %v61_v40 = vld [vmem:[%s2846_s0 + $0x28] sm:$0xff] }
  0x46   :  { %v2488_v41 = vld [vmem:[#allocation2 + $0x480] ss:$12 sps:$4 sm:$0xff]  }
  0x47   :  { %1228 = vmatpush2.bf16.msra.mxu0 %v2409_v42  ;;  %v2493_v42 = vld [vmem:[#allocation2 + $0x46c] ss:$12 sps:$4 sm:$0xff]  }
  0x48   :  { %1229 = vmatprep.subr.bf16.mxu0 %v2413_v43  ;;  %1269 = vmatpush2.bf16.msra.mxu1 %v2412_v44  ;;  %v2756_v43 = vpack.c.bf16 %v61_v40, %v61_v40  ;;  %v2491_v44 = vld [vmem:[#allocation2 + $0x468] ss:$12 sps:$4 sm:$0xff]   ;;  %v2554_v40 = vld [vmem:[#allocation2 + $0x338] ss:$12 sps:$4 sm:$0xff]  }
  0x49   :  { %1270 = vmatprep.subr.bf16.mxu1 %v2416_v45  ;;  %v62_v45 = vld [vmem:[%s2846_s0 + $0x30] sm:$0xff] }
  0x4b   :  { %1230 = vmatpush2.bf16.msra.mxu0 %v2415_v47  ;;  %v2495_v47 = vld [vmem:[#allocation2 + $0xb0] ss:$12 sps:$4 sm:$0xff]  }
  0x4c   :  { %1231 = vmatprep.subr.bf16.mxu0 %v2419_v49  ;;  %1271 = vmatpush2.bf16.msra.mxu1 %v2418_v51  ;;  %v2762_v49 = vpack.c.bf16 %v62_v45, %v62_v45  ;;  %v2496_v51 = vld [vmem:[#allocation2 + $0x450] ss:$12 sps:$4 sm:$0xff]   ;;  %v2561_v45 = vld [vmem:[#allocation2 + $0x3c8] ss:$12 sps:$4 sm:$0xff]  }
  0x4d   :  { %1272 = vmatprep.subr.bf16.mxu1 %v2422_v53  ;;  %v2499_v53 = vld [vmem:[#allocation2 + $0x158] ss:$12 sps:$4 sm:$0xff]  }
  0x4f   :  { %1232 = vmatpush2.bf16.msra.mxu0 %v2421_v54  ;;  %v2500_v54 = vld [vmem:[#allocation2 + $0x98] ss:$12 sps:$4 sm:$0xff]  }
  0x50   :  { %1233 = vmatprep.subr.bf16.mxu0 %v2425_v55  ;;  %1273 = vmatpush2.bf16.msra.mxu1 %v2424_v56  ;;  %v2503_v55 = vld [vmem:[#allocation2 + $0x43c] ss:$12 sps:$4 sm:$0xff]   ;;  %v2501_v56 = vld [vmem:[#allocation2 + $0x438] ss:$12 sps:$4 sm:$0xff]  }
  0x51   :  { %1274 = vmatprep.subr.bf16.mxu1 %v2428_v57  ;;  %v2504_v57 = vld [vmem:[#allocation2 + $0x140] ss:$12 sps:$4 sm:$0xff]  }
  0x53   :  { %1234 = vmatpush2.bf16.msra.mxu0 %v2427_v58  ;;  %v2505_v58 = vld [vmem:[#allocation2 + $0x80] ss:$12 sps:$4 sm:$0xff]  }
  0x54   :  { %1235 = vmatprep.subr.bf16.mxu0 %v2431_v59  ;;  %1275 = vmatpush2.bf16.msra.mxu1 %v2430_v60  ;;  %v2508_v59 = vld [vmem:[#allocation2 + $0x424] ss:$12 sps:$4 sm:$0xff]   ;;  %v2506_v60 = vld [vmem:[#allocation2 + $0x420] ss:$12 sps:$4 sm:$0xff]  }
  0x55   :  { %1276 = vmatprep.subr.bf16.mxu1 %v2434_v61  ;;  %v2509_v61 = vld [vmem:[#allocation2 + $0x128] ss:$12 sps:$4 sm:$0xff]  }
  0x57   :  { %1236 = vmatpush2.bf16.msra.mxu0 %v2433_v62  ;;  %v2510_v62 = vld [vmem:[#allocation2 + $0x68] ss:$12 sps:$4 sm:$0xff]  }
  0x58   :  { %1237 = vmatprep.subr.bf16.mxu0 %v2437_v63  ;;  %1277 = vmatpush2.bf16.msra.mxu1 %v2436_v0  ;;  %v2513_v63 = vld [vmem:[#allocation2 + $0x40c] ss:$12 sps:$4 sm:$0xff]   ;;  %v2511_v0 = vld [vmem:[#allocation2 + $0x408] ss:$12 sps:$4 sm:$0xff]  }
  0x59   :  { %1278 = vmatprep.subr.bf16.mxu1 %v2440_v2  ;;  %v2518_v2 = vld [vmem:[#allocation2 + $0x3f4] ss:$12 sps:$4 sm:$0xff]  }
  0x5b   :  { %1238 = vmatpush2.bf16.msra.mxu0 %v2439_v1  ;;  %v2514_v1 = vld [vmem:[#allocation2 + $0x110] ss:$12 sps:$4 sm:$0xff]  }
  0x5c   :  { %1289 = vmatprep.subr.bf16.mxu0 %v2445_v5  ;;  %1279 = vmatpush2.bf16.msra.mxu1 %v2442_v3  ;;  %v2516_v3 = vld [vmem:[#allocation2 + $0x3f0] ss:$12 sps:$4 sm:$0xff]   ;;  %v2520_v5 = vld [vmem:[#allocation2 + $0x38] ss:$12 sps:$4 sm:$0xff]  }
  0x5d   :  { %1330 = vmatprep.subr.bf16.mxu1 %v2448_v8  ;;  %v2521_v8 = vld [vmem:[#allocation2 + $0x3d8] ss:$12 sps:$4 sm:$0xff]  }
  0x5e   :  { %1240 = vmatmul.mubr.bf16.vlgmr.msra.gmra.mxu0 %v2747_v7 }
  0x5f   :  { %1290 = vmatpush1.bf16.msra.mxu0 %v2443_v9  ;;  %1281 = vmatmul.mubr.bf16.vlgmr.msra.gmra.mxu1 %v2749_v10  ;;  %v2524_v9 = vld [vmem:[#allocation2 + $0xe0] ss:$12 sps:$4 sm:$0xff]  }
  0x60   :  { %1291 = vmatprep.subr.bf16.mxu0 %v2451_v11  ;;  %1331 = vmatpush1.bf16.msra.mxu1 %v2446_v12  ;;  %v2525_v11 = vld [vmem:[#allocation2 + $0x20] ss:$12 sps:$4 sm:$0xff]   ;;  %v2528_v12 = vld [vmem:[#allocation2 + $0x3c4] ss:$12 sps:$4 sm:$0xff]  }
  0x61   :  { %1362 = vmatprep.mubr.bf16.mxu1 %v2679_v17  ;;  %1332 = vmatprep.subr.bf16.mxu1 %v2454_v13  ;;  %v2526_v13 = vld [vmem:[#allocation2 + $0x3c0] ss:$12 sps:$4 sm:$0xff]   ;;  %v2531_v17 = vld [vmem:[#allocation2 + $0x2f0] ss:$12 sps:$4 sm:$0xff]  }
  0x62   :  { %1321 = vmatprep.mubr.bf16.mxu0 %v2756_v43 }
  0x63   :  { %1292 = vmatpush1.bf16.msra.mxu0 %v2449_v14  ;;  %v2529_v14 = vld [vmem:[#allocation2 + $0xc8] ss:$12 sps:$4 sm:$0xff]  }
  0x64   :  { %1293 = vmatprep.subr.bf16.mxu0 %v2457_v15  ;;  %1333 = vmatpush1.bf16.msra.mxu1 %v2452_v16  ;;  %v2530_v15 = vld [vmem:[#allocation2 + $0x8] ss:$12 sps:$4 sm:$0xff]   ;;  %v60_v16 = vld [vmem:[%s2846_s0 + $0x20] sm:$0xff] }
  0x65   :  { %1334 = vmatprep.subr.bf16.mxu1 %v2460_v18  ;;  %v2532_v18 = vld [vmem:[#allocation2 + $0x230] ss:$12 sps:$4 sm:$0xff]  }
  0x67   :  { %1294 = vmatpush1.bf16.msra.mxu0 %v2455_v19  ;;  %v2769_v19 = vpack.c.bf16 %v60_v16, %v60_v16  ;;  %v2592_v16 = vld [vmem:[#allocation5 + $0x90] sm:$0xff]  }
  0x68   :  { %1295 = vmatprep.subr.bf16.mxu0 %v2463_v20  ;;  %1335 = vmatpush1.bf16.msra.mxu1 %v2458_v21  ;;  %v2533_v20 = vld [vmem:[#allocation2 + $0x470] ss:$12 sps:$4 sm:$0xff]  }
  0x69   :  { %1336 = vmatprep.subr.bf16.mxu1 %v2466_v22  ;;  %v2534_v21 = vld [vmem:[#allocation2 + $0x3b0] ss:$12 sps:$4 sm:$0xff]   ;;  %v2535_v22 = vld [vmem:[#allocation2 + $0x2d8] ss:$12 sps:$4 sm:$0xff]  }
  0x6b   :  { %1296 = vmatpush1.bf16.msra.mxu0 %v2461_v23  ;;  %v2536_v23 = vld [vmem:[#allocation2 + $0x218] ss:$12 sps:$4 sm:$0xff]  }
  0x6c   :  { %1297 = vmatprep.subr.bf16.mxu0 %v2469_v24  ;;  %1337 = vmatpush1.bf16.msra.mxu1 %v2464_v25  ;;  %v2537_v24 = vld [vmem:[#allocation2 + $0x458] ss:$12 sps:$4 sm:$0xff]  }
  0x6d   :  { %1338 = vmatprep.subr.bf16.mxu1 %v2472_v26  ;;  %v2538_v25 = vld [vmem:[#allocation2 + $0x398] ss:$12 sps:$4 sm:$0xff]   ;;  %v2539_v26 = vld [vmem:[#allocation2 + $0x2c0] ss:$12 sps:$4 sm:$0xff]  }
  0x6f   :  { %1298 = vmatpush1.bf16.msra.mxu0 %v2467_v27  ;;  %v2540_v27 = vld [vmem:[#allocation2 + $0x200] ss:$12 sps:$4 sm:$0xff]  }
  0x70   :  { %1299 = vmatprep.subr.bf16.mxu0 %v2475_v28  ;;  %1339 = vmatpush1.bf16.msra.mxu1 %v2470_v29  ;;  %v2541_v28 = vld [vmem:[#allocation2 + $0x440] ss:$12 sps:$4 sm:$0xff]   ;;  %v2543_v29 = vld [vmem:[#allocation2 + $0x2a8] ss:$12 sps:$4 sm:$0xff]  }
  0x71   :  { %1340 = vmatprep.subr.bf16.mxu1 %v2478_v30  ;;  %v2542_v30 = vld [vmem:[#allocation2 + $0x380] ss:$12 sps:$4 sm:$0xff]  }
  0x73   :  { %1300 = vmatpush1.bf16.msra.mxu0 %v2473_v31  ;;  %v2544_v31 = vld [vmem:[#allocation2 + $0x1e8] ss:$12 sps:$4 sm:$0xff]  }
  0x74   :  { %1301 = vmatprep.subr.bf16.mxu0 %v2481_v32  ;;  %1341 = vmatpush1.bf16.msra.mxu1 %v2476_v33  ;;  %v2545_v32 = vld [vmem:[#allocation2 + $0x428] ss:$12 sps:$4 sm:$0xff]   ;;  %v2547_v33 = vld [vmem:[#allocation2 + $0x290] ss:$12 sps:$4 sm:$0xff]  }
  0x75   :  { %1342 = vmatprep.subr.bf16.mxu1 %v2484_v34  ;;  %v2548_v34 = vld [vmem:[#allocation2 + $0x1d0] ss:$12 sps:$4 sm:$0xff]  }
  0x77   :  { %1302 = vmatpush1.bf16.msra.mxu0 %v2479_v35  ;;  %v2551_v35 = vld [vmem:[#allocation2 + $0x278] ss:$12 sps:$4 sm:$0xff]  }
  0x78   :  { %1303 = vmatprep.subr.bf16.mxu0 %v2487_v36  ;;  %1343 = vmatpush1.bf16.msra.mxu1 %v2482_v37  ;;  %v2550_v36 = vld [vmem:[#allocation2 + $0x350] ss:$12 sps:$4 sm:$0xff]   ;;  %v2553_v37 = vld [vmem:[#allocation2 + $0x3f8] ss:$12 sps:$4 sm:$0xff]  }
  0x79   :  { %1344 = vmatprep.subr.bf16.mxu1 %v2490_v38  ;;  %v2552_v38 = vld [vmem:[#allocation2 + $0x1b8] ss:$12 sps:$4 sm:$0xff]  }
  0x7b   :  { %1304 = vmatpush1.bf16.msra.mxu0 %v2485_v39  ;;  %v2555_v39 = vld [vmem:[#allocation2 + $0x260] ss:$12 sps:$4 sm:$0xff]  }
  0x7c   :  { %1305 = vmatprep.subr.bf16.mxu0 %v2493_v42  ;;  %1345 = vmatpush1.bf16.msra.mxu1 %v2488_v41  ;;  %v2557_v41 = vld [vmem:[#allocation2 + $0x3e0] ss:$12 sps:$4 sm:$0xff]  }
  0x7d   :  { %2162 = vmatprep.subr.bf16.mxu1 %v2494_v46  ;;  %v2556_v42 = vld [vmem:[#allocation2 + $0x1a0] ss:$12 sps:$4 sm:$0xff]   ;;  %v2560_v46 = vld [vmem:[#allocation2 + $0x188] ss:$12 sps:$4 sm:$0xff]  }
  0x7f   :  { %1306 = vmatpush2.bf16.msra.mxu0 %v2491_v44  ;;  %1363 = vmatmul.mubr.bf16.vlgmr.msra.gmra.mxu1 %v2762_v49  ;;  %v2558_v44 = vld [vmem:[#allocation2 + $0x320] ss:$12 sps:$4 sm:$0xff]  }
  0x80   :  { %1307 = vmatprep.subr.bf16.mxu0 %v2498_v50  ;;  %2163 = vmatpush3.bf16.msra.mxu1 %v2495_v47  ;;  %v2562_v47 = vld [vmem:[#allocation2 + $0x308] ss:$12 sps:$4 sm:$0xff]   ;;  %v2571_v50 = vld [vmem:[#allocation5 + $0x78] sm:$0xff]  }
  0x81   :  { %1403 = vmatprep.mubr.bf16.mxu1 %v2732_v48  ;;  %2164 = vmatprep.subr.bf16.mxu1 %v2499_v53  ;;  %v2515_v48 = vld [vmem:[#allocation2 + $0x50] ss:$12 sps:$4 sm:$0xff]   ;;  %v2680_v53 = vmov 0.0  }
  0x83   :  { %1308 = vmatpush2.bf16.msra.mxu0 %v2496_v51  ;;  %v2563_v51 = vld [vmem:[#allocation2 + $0x530] ss:$12 sps:$4 sm:$0xff]  }
  0x84   :  { %1309 = vmatprep.subr.bf16.mxu0 %v2503_v55  ;;  %2165 = vmatpush3.bf16.msra.mxu1 %v2500_v54  ;;  %v2572_v54 = vld [vmem:[#allocation5 + $0x38] sm:$0xff]   ;;  %v2573_v55 = vld [vmem:[#allocation5 + $0x70] sm:$0xff]  }
  0x85   :  { %2166 = vmatprep.subr.bf16.mxu1 %v2504_v57  ;;  %v2574_v57 = vld [vmem:[#allocation5 + $0x30] sm:$0xff]  }
  0x87   :  { %1310 = vmatpush2.bf16.msra.mxu0 %v2501_v56  ;;  %v2564_v56 = vld [vmem:[#allocation2 + $0x518] ss:$12 sps:$4 sm:$0xff]  }
  0x88   :  { %1311 = vmatprep.subr.bf16.mxu0 %v2508_v59  ;;  %2167 = vmatpush3.bf16.msra.mxu1 %v2505_v58  ;;  %v2575_v58 = vld [vmem:[#allocation5 + $0x68] sm:$0xff]  }
  0x89   :  { %2168 = vmatprep.subr.bf16.mxu1 %v2509_v61  ;;  %v2565_v59 = vld [vmem:[#allocation2 + $0x500] ss:$12 sps:$4 sm:$0xff]   ;;  %v2566_v61 = vld [vmem:[#allocation2 + $0x4e8] ss:$12 sps:$4 sm:$0xff]  }
  0x8b   :  { %1312 = vmatpush2.bf16.msra.mxu0 %v2506_v60  ;;  %v2577_v60 = vld [vmem:[#allocation5 + $0x60] sm:$0xff]  }
  0x8c   :  { %1313 = vmatprep.subr.bf16.mxu0 %v2513_v63  ;;  %2169 = vmatpush3.bf16.msra.mxu1 %v2510_v62  ;;  %v2578_v62 = vld [vmem:[#allocation5 + $0x20] sm:$0xff]   ;;  %v2579_v63 = vld [vmem:[#allocation5 + $0x58] sm:$0xff]  }
  0x8d   :  { %2170 = vmatprep.subr.bf16.mxu1 %v2514_v1  ;;  %v2580_v1 = vld [vmem:[#allocation5 + $0x18] sm:$0xff]  }
  0x8f   :  { %1314 = vmatpush2.bf16.msra.mxu0 %v2511_v0  ;;  %v2567_v0 = vld [vmem:[#allocation2 + $0x4d0] ss:$12 sps:$4 sm:$0xff]  }
  0x90   :  { %1315 = vmatprep.subr.bf16.mxu0 %v2518_v2  ;;  %2171 = vmatpush3.bf16.msra.mxu1 %v2515_v48  ;;  %v2568_v48 = vld [vmem:[#allocation2 + $0x4b8] ss:$12 sps:$4 sm:$0xff]   ;;  %v2569_v2 = vld [vmem:[#allocation2 + $0x4a0] ss:$12 sps:$4 sm:$0xff]  }
  0x91   :  { %2172 = vmatprep.subr.bf16.mxu1 %v2519_v4  ;;  %v2581_v4 = vld [vmem:[#allocation5 + $0x50] sm:$0xff]  }
  0x93   :  { %1316 = vmatpush2.bf16.msra.mxu0 %v2516_v3  ;;  %v2570_v3 = vld [vmem:[#allocation2 + $0x488] ss:$12 sps:$4 sm:$0xff]  }
  0x94   :  { %1317 = vmatprep.subr.bf16.mxu0 %v2523_v6  ;;  %2173 = vmatpush3.bf16.msra.mxu1 %v2520_v5  ;;  %v2582_v5 = vld [vmem:[#allocation5 + $0x10] sm:$0xff]   ;;  %v2583_v6 = vld [vmem:[#allocation5 + $0x48] sm:$0xff]  }
  0x95   :  { %2174 = vmatprep.subr.bf16.mxu1 %v2524_v9  ;;  %v2585_v9 = vld [vmem:[#allocation5 + $0x40] sm:$0xff]  }
  0x97   :  { %1318 = vmatpush2.bf16.msra.mxu0 %v2521_v8  ;;  %v2584_v8 = vld [vmem:[#allocation5 + $0x8] sm:$0xff]  }
  0x98   :  { %1319 = vmatprep.subr.bf16.mxu0 %v2528_v12  ;;  %2175 = vmatpush3.bf16.msra.mxu1 %v2525_v11  ;;  %v2586_v11 = vld [vmem:[#allocation5] sm:$0xff]   ;;  %v2587_v12 = vld [vmem:[#allocation5 + $0xb8] sm:$0xff]  }
  0x99   :  { %2176 = vmatprep.subr.bf16.mxu1 %v2529_v14  ;;  %v2590_v14 = vld [vmem:[#allocation5 + $0xa0] sm:$0xff]  }
  0x9b   :  { %1320 = vmatpush2.bf16.msra.mxu0 %v2526_v13  ;;  %v2588_v13 = vld [vmem:[#allocation5 + $0xb0] sm:$0xff]  }
  0x9c   :  { %2184 = vmatprep.subr.bf16.mxu0 %v2531_v17  ;;  %2177 = vmatpush3.bf16.msra.mxu1 %v2530_v15  ;;  %v2591_v15 = vld [vmem:[#allocation5 + $0x98] sm:$0xff]   ;;  %v2593_v17 = vld [vmem:[#allocation5 + $0x88] sm:$0xff]  }
  0x9d   :  { %2206 = vmatprep.subr.bf16.mxu1 %v2533_v20 }
  0x9e   :  { %1322 = vmatmul.mubr.bf16.vlgmr.msra.gmra.mxu0 %v2769_v19 }
  0x9f   :  { %2185 = vmatpush3.bf16.msra.mxu0 %v2532_v18  ;;  %1443 = vmatprep.mubr.bf16.mxu0 %v2738_v52  ;;  %v2546_v52 = vld [vmem:[#allocation2 + $0x368] ss:$12 sps:$4 sm:$0xff]  }
  0xa0   :  { %1404 = vmatmul.mubr.bf16.vlgmr.msra.gmra.mxu1 %v2747_v7  ;;  %2186 = vmatprep.subr.bf16.mxu0 %v2535_v22  ;;  %v2549_v7 = vld [vmem:[#allocation2 + $0x410] ss:$12 sps:$4 sm:$0xff]  }
  0xa1   :  { %2207 = vmatpush3.bf16.msra.mxu1 %v2534_v21  ;;  %1483 = vmatprep.mubr.bf16.mxu1 %v2756_v43  ;;  %v2559_v43 = vld [vmem:[#allocation2 + $0x248] ss:$12 sps:$4 sm:$0xff]   ;;  %v2594_v21 = vld [vmem:[#allocation5 + $0x80] sm:$0xff]  }
  0xa2   :  { %2208 = vmatprep.subr.bf16.mxu1 %v2537_v24 }
  0xa3   :  { %2187 = vmatpush3.bf16.msra.mxu0 %v2536_v23 }
  0xa4   :  { %2188 = vmatprep.subr.bf16.mxu0 %v2539_v26 }
  0xa5   :  { %2209 = vmatpush3.bf16.msra.mxu1 %v2538_v25 }
  0xa6   :  { %2210 = vmatprep.subr.bf16.mxu1 %v2541_v28 }
  0xa7   :  { %2189 = vmatpush3.bf16.msra.mxu0 %v2540_v27 }
  0xa8   :  { %2190 = vmatprep.subr.bf16.mxu0 %v2543_v29 }
  0xa9   :  { %2211 = vmatpush3.bf16.msra.mxu1 %v2542_v30 }
  0xaa   :  { %2212 = vmatprep.subr.bf16.mxu1 %v2545_v32 }
  0xab   :  { %2191 = vmatpush3.bf16.msra.mxu0 %v2544_v31  ;;  %v296_v31 = vlaneseq }
  0xac   :  { %2192 = vmatprep.subr.bf16.mxu0 %v2547_v33  ;;  %v294_v33 = vld [vmem:[%s2848_s2] sm:$0x7] }
  0xad   :  { %2213 = vmatpush3.bf16.msra.mxu1 %v2546_v52  ;;  %v297_v32 = vshrl.u32 %v296_v31, 7 }
  0xae   :  { %2214 = vmatprep.subr.bf16.mxu1 %v2549_v7 }
  0xaf   :  { %2193 = vmatpush3.bf16.msra.mxu0 %v2548_v34  ;;  %v298_v52 = vsub.s32 0, %v297_v32  ;;  %v302_v7 = vsub.s32 1, %v297_v32 }
  0xb0   :  { %2194 = vmatprep.subr.bf16.mxu0 %v2551_v35 }
  0xb1   :  { %2215 = vmatpush3.bf16.msra.mxu1 %v2550_v36  ;;  %v299_v34 = vrot.slane %v294_v33, %v298_v52  ;;  %v303_v35 = vrot.slane %v294_v33, %v302_v7 }
  0xb2   :  { %2216 = vmatprep.subr.bf16.mxu1 %v2553_v37 }
  0xb3   :  { %2195 = vmatpush3.bf16.msra.mxu0 %v2552_v38 }
  0xb4   :  { %2196 = vmatprep.subr.bf16.mxu0 %v2555_v39 }
  0xb5   :  { %2217 = vmatpush3.bf16.msra.mxu1 %v2554_v40 }
  0xb6   :  { %2218 = vmatprep.subr.bf16.mxu1 %v2557_v41 }
  0xb7   :  { %2197 = vmatpush3.bf16.msra.mxu0 %v2556_v42 }
  0xb8   :  { %2198 = vmatprep.subr.bf16.mxu0 %v2559_v43 }
  0xb9   :  { %2219 = vmatpush3.bf16.msra.mxu1 %v2558_v44 }
  0xba   :  { %2220 = vmatprep.subr.bf16.mxu1 %v2561_v45 }
  0xbb   :  { %2199 = vmatpush3.bf16.msra.mxu0 %v2560_v46 }
  0xbc   :  { %2277 = vmatprep.subr.bf16.mxu0 %v2680_v53 }
  0xbd   :  { %2221 = vmatpush3.bf16.msra.mxu1 %v2562_v47 }
  0xbe   :  { %1444 = vmatmul.mubr.bf16.vlgmr.msra.gmra.mxu0 %v2749_v10  ;;  %2237 = vmatprep.subr.bf16.mxu1 %v2571_v50  ;;  %v2576_v10 = vld [vmem:[#allocation5 + $0x28] sm:$0xff]  }
  0xbf   :  { %2278 = vmatpush3.bf16.msra.mxu0 %v2563_v51  ;;  %2293 = vmatprep.mubr.msk.bf16.mxu0 %vm2681_vm0, %v2680_v53 }
  0xc0   :  { %1484 = vmatmul.mubr.bf16.vlgmr.msra.gmra.mxu1 %v2769_v19  ;;  %2279 = vmatprep.subr.bf16.mxu0 %v2680_v53 }
  0xc1   :  { %2238 = vmatpush3.bf16.msra.mxu1 %v2572_v54 }
  0xc2   :  { %2239 = vmatprep.subr.bf16.mxu1 %v2573_v55 }
  0xc3   :  { %2280 = vmatpush3.bf16.msra.mxu0 %v2564_v56 }
  0xc4   :  { %2281 = vmatprep.subr.bf16.mxu0 %v2680_v53 }
  0xc5   :  { %2240 = vmatpush3.bf16.msra.mxu1 %v2574_v57 }
  0xc6   :  { %2241 = vmatprep.subr.bf16.mxu1 %v2575_v58 }
  0xc7   :  { %2282 = vmatpush3.bf16.msra.mxu0 %v2565_v59 }
  0xc8   :  { %2283 = vmatprep.subr.bf16.mxu0 %v2680_v53 }
  0xc9   :  { %2242 = vmatpush3.bf16.msra.mxu1 %v2576_v10 }
  0xca   :  { %2243 = vmatprep.subr.bf16.mxu1 %v2577_v60 }
  0xcb   :  { %2284 = vmatpush3.bf16.msra.mxu0 %v2566_v61 }
  0xcc   :  { %2285 = vmatprep.subr.bf16.mxu0 %v2680_v53 }
  0xcd   :  { %2244 = vmatpush3.bf16.msra.mxu1 %v2578_v62 }
  0xce   :  { %2245 = vmatprep.subr.bf16.mxu1 %v2579_v63 }
  0xcf   :  { %2286 = vmatpush3.bf16.msra.mxu0 %v2567_v0 }
  0xd0   :  { %2287 = vmatprep.subr.bf16.mxu0 %v2680_v53 }
  0xd1   :  { %2246 = vmatpush3.bf16.msra.mxu1 %v2580_v1 }
  0xd2   :  { %2247 = vmatprep.subr.bf16.mxu1 %v2581_v4 }
  0xd3   :  { %2288 = vmatpush3.bf16.msra.mxu0 %v2568_v48 }
  0xd4   :  { %2289 = vmatprep.subr.bf16.mxu0 %v2680_v53 }
  0xd5   :  { %2248 = vmatpush3.bf16.msra.mxu1 %v2582_v5 }
  0xd6   :  { %2249 = vmatprep.subr.bf16.mxu1 %v2583_v6 }
  0xd7   :  { %2290 = vmatpush3.bf16.msra.mxu0 %v2569_v2  ;;  %v306_v2 = vsub.s32 2, %v297_v32  ;;  %v2128_v32 = vld [vmem:[%s2850_s4] ss:$0 sm:$0xff]  ;;  %s2682_s4 = smov [#allocation7]  }
  0xd8   :  { %2291 = vmatprep.subr.bf16.mxu0 %v2680_v53  ;;  %s1950_s21 = sshll.u32 %s2682_s4, 4  ;;  %s1951_s21 = int_to_ptr.vmem [resolvable:$true] %s1950_s21 }
  0xd9   :  { %2250 = vmatpush3.bf16.msra.mxu1 %v2584_v8  ;;  %p2652_p11 = scmp.lt.s32.totalorder %s1951_s21, %s1951_s21 }
  0xda   :  { %2251 = vmatprep.subr.bf16.mxu1 %v2585_v9 }
  0xdb   :  { %2292 = vmatpush3.bf16.msra.mxu0 %v2570_v3  ;;  %v307_v3 = vrot.slane %v294_v33, %v306_v2 }
  0xdc   :  { %2297 = vmatprep.subr.bf16.mxu0 %v2680_v53 }
  0xdd   :  { %2252 = vmatpush3.bf16.msra.mxu1 %v2586_v11 }
  0xde   :  { %2294 = vmatmul.mubr.bf16.vlgmr.msra.gmra.mxu0 %v2762_v49  ;;  %2317 = vmatprep.subr.bf16.mxu1 %v2680_v53  ;;  %v2589_v49 = vld [vmem:[#allocation5 + $0xa8] sm:$0xff]  }
  0xdf   :  { %2313 = vmatprep.mubr.msk.bf16.mxu0 %vm2681_vm0, %v2680_v53  ;;  %2298 = vmatpush3.bf16.msra.mxu0 %v2587_v12 }
  0xe0   :  { %2299 = vmatprep.subr.bf16.mxu0 %v2680_v53 }
  0xe3   :  { %2300 = vmatpush3.bf16.msra.mxu0 %v2588_v13 }
  0xe4   :  { %2301 = vmatprep.subr.bf16.mxu0 %v2680_v53 }
  0xe7   :  { %2302 = vmatpush3.bf16.msra.mxu0 %v2589_v49 }
  0xe8   :  { %2303 = vmatprep.subr.bf16.mxu0 %v2680_v53 }
  0xeb   :  { %2304 = vmatpush3.bf16.msra.mxu0 %v2590_v14 }
  0xec   :  { %2305 = vmatprep.subr.bf16.mxu0 %v2680_v53 }
  0xef   :  { %2306 = vmatpush3.bf16.msra.mxu0 %v2591_v15 }
  0xf0   :  { %2307 = vmatprep.subr.bf16.mxu0 %v2680_v53 }
  0xf3   :  { %2308 = vmatpush3.bf16.msra.mxu0 %v2592_v16 }
  0xf4   :  { %2309 = vmatprep.subr.bf16.mxu0 %v2680_v53 }
  0xf7   :  { %2310 = vmatpush3.bf16.msra.mxu0 %v2593_v17 }
  0xf8   :  { %2311 = vmatprep.subr.bf16.mxu0 %v2680_v53 }
  0xfb   :  { %2312 = vmatpush3.bf16.msra.mxu0 %v2594_v21  ;;  %v2598_v21 = vld [vmem:[%s2851_s5 + $0x20] sm:$0xff]  }
 0x11e   :  { %v1241_v18 = vpop.f32.mrf.mxu0 }
 0x11f   :  { %v1282_v20 = vpop.f32.mrf.mxu1  ;;  %v1242_v36 = vadd.f32 %v1241_v18, %v299_v34  ;;  %v2595_v18 = vld [vmem:[%s2851_s5 + $0x38] sm:$0xff]  }
 0x120   :  { %v1243_v19 = vpop.f32.mrf.mxu0 }
 0x121   :  { %v1284_v23 = vpop.f32.mrf.mxu1  ;;  %v1244_v37 = vadd.f32 %v1243_v19, %v303_v35  ;;  %v1283_v38 = vadd.f32 %v1282_v20, %v1242_v36  ;;  %v2596_v19 = vld [vmem:[%s2851_s5 + $0x30] sm:$0xff]   ;;  %v2597_v20 = vld [vmem:[%s2851_s5 + $0x28] sm:$0xff]  }
 0x122   :  { %v1245_v22 = vpop.f32.mrf.mxu0 }
 0x123   :  { %v1286_v25 = vpop.f32.mrf.mxu1  ;;  %v1285_v40 = vadd.f32 %v1284_v23, %v1244_v37  ;;  %v2599_v22 = vld [vmem:[%s2851_s5 + $0x18] sm:$0xff]   ;;  %v2600_v23 = vld [vmem:[%s2851_s5 + $0x10] sm:$0xff]  }
 0x124   :  { %v1246_v24 = vpop.f32.mrf.mxu0  ;;  %v2602_v25 = vld [vmem:[%s2851_s5] sm:$0xff]  }
 0x125   :  { %v1287_v26 = vpop.f32.mrf.mxu1  ;;  %v2601_v24 = vld [vmem:[%s2851_s5 + $0x8] sm:$0xff]  }
 0x13f   :  { %v1364_v27 = vpop.f32.mrf.mxu1 }
 0x141   :  { %v1366_v28 = vpop.f32.mrf.mxu1 }
 0x143   :  { %v1368_v29 = vpop.f32.mrf.mxu1 }
 0x145   :  { %v1369_v30 = vpop.f32.mrf.mxu1 }
 0x15e   :  { %v1323_v39 = vpop.f32.mrf.mxu0 }
 0x15f   :  { %v1324_v41 = vadd.f32 %v1323_v39, %v1283_v38  ;;  %v1930_v38 = vand.u32 127, %v296_v31  ;;  %v2153_v39 = vld [vmem:[%s2852_s6] ss:$0 sm:$0xff]  ;;  %s2647_s6 = scalar_lea.vmem %s1951_s21, 128 }
 0x160   :  { %v1325_v42 = vpop.f32.mrf.mxu0  ;;  %v2178_v43 = vpop.f32.mrf.mxu1  ;;  %p2648_p10 = scmp.ne.s32.totalorder %s1951_s21, %s2647_s6  ;;  %p2653_p12 = scmp.lt.s32.totalorder %s2647_s6, %s2647_s6 }
 0x161   :  { %v1365_v44 = vadd.f32 %v1364_v27, %v1324_v41  ;;  %v1326_v45 = vadd.f32 %v1325_v42, %v1285_v40  ;;  %vm1931_vm1 = vcmp.lt.s32.totalorder %v1930_v38, 10 }
 0x162   :  { %v1327_v46 = vpop.f32.mrf.mxu0  ;;  %v2179_v47 = vpop.f32.mrf.mxu1  ;;  %p2654_p13 = por %p2653_p12, %p2652_p11 }
 0x163   :  { %v1367_v50 = vadd.f32 %v1366_v28, %v1326_v45  ;;  %v1531_v51 = vmax.f32 %v1365_v44, 0.0  ;;  %v2180_v4 = vadd.f32 %v2179_v47, %v2178_v43 }
 0x164   :  { %v1328_v54 = vpop.f32.mrf.mxu0  ;;  %v2181_v55 = vpop.f32.mrf.mxu1  ;;  %p2655_p0 = pnand %p2654_p13, %p2648_p10 }
 0x165   :  { %v1532_v56 = vmax.f32 %v1367_v50, 0.0  ;;  %v1534_v59 = vpack.c.bf16 %v1531_v51, %v1531_v51  ;;  %v1406_v6 = vadd.f32 %v2180_v4, %v307_v3 }
 0x166   :  { %v2182_v57 = vpop.f32.mrf.mxu1 }
 0x167   :  { %v1535_v58 = vpack.c.bf16 %v1532_v56, %v1532_v56 }
 0x169   :  { %1768 = vmatprep.mubr.bf16.mxu1 %v1535_v58 }
 0x16a   :  { %1769 = vmatmul.mubr.bf16.vlgmr.msra.gmra.mxu1 %v1534_v59 }
 0x16b   :  { %2333 = vmatprep.mubr.msk.bf16.mxu1 %vm2681_vm0, %v2680_v53  ;;  %2318 = vmatpush3.bf16.msra.mxu1 %v2595_v18 }
 0x16c   :  { %2319 = vmatprep.subr.bf16.mxu1 %v2680_v53 }
 0x16f   :  { %2320 = vmatpush3.bf16.msra.mxu1 %v2596_v19 }
 0x170   :  { %2321 = vmatprep.subr.bf16.mxu1 %v2680_v53 }
 0x173   :  { %2322 = vmatpush3.bf16.msra.mxu1 %v2597_v20 }
 0x174   :  { %2323 = vmatprep.subr.bf16.mxu1 %v2680_v53 }
 0x177   :  { %2324 = vmatpush3.bf16.msra.mxu1 %v2598_v21 }
 0x178   :  { %2325 = vmatprep.subr.bf16.mxu1 %v2680_v53 }
 0x17b   :  { %2326 = vmatpush3.bf16.msra.mxu1 %v2599_v22 }
 0x17c   :  { %2327 = vmatprep.subr.bf16.mxu1 %v2680_v53 }
 0x17e   :  { %v2200_v10 = vpop.f32.mrf.mxu0 }
 0x17f   :  { %2328 = vmatpush3.bf16.msra.mxu1 %v2600_v23 }
 0x180   :  { %v2201_v60 = vpop.f32.mrf.mxu0  ;;  %v2222_v61 = vpop.f32.mrf.mxu1  ;;  %2329 = vmatprep.subr.bf16.mxu1 %v2680_v53 }
 0x181   :  { %v2202_v5 = vadd.f32 %v2201_v60, %v2200_v10 }
 0x182   :  { %v2203_v62 = vpop.f32.mrf.mxu0  ;;  %v2223_v63 = vpop.f32.mrf.mxu1 }
 0x183   :  { %v1446_v8 = vadd.f32 %v2202_v5, %v1406_v6  ;;  %v2224_v9 = vadd.f32 %v2223_v63, %v2222_v61  ;;  %2330 = vmatpush3.bf16.msra.mxu1 %v2601_v24 }
 0x184   :  { %v2204_v0 = vpop.f32.mrf.mxu0  ;;  %v2225_v1 = vpop.f32.mrf.mxu1  ;;  %2331 = vmatprep.subr.bf16.mxu1 %v2680_v53 }
 0x185   :  { %v1486_v11 = vadd.f32 %v2224_v9, %v1446_v8 }
 0x186   :  { %v2226_v48 = vpop.f32.mrf.mxu1 }
 0x187   :  { %2332 = vmatpush3.bf16.msra.mxu1 %v2602_v25 }
 0x19e   :  { %v1525_v12 = vpop.f32.mrf.mxu0 }
 0x19f   :  { %v1526_v13 = vadd.f32 %v1525_v12, %v1486_v11 }
 0x1a0   :  { %v2295_v49 = vpop.f32.mrf.mxu0 }
 0x1a1   :  { %v1533_v14 = vmax.f32 %v1526_v13, 0.0 }
 0x1a2   :  { %v1528_v15 = vpop.f32.mrf.mxu0 }
 0x1a3   :  { %v1536_v16 = vpack.c.bf16 %v1533_v14, %v1533_v14 }
 0x1a4   :  { %v2296_v17 = vpop.f32.mrf.mxu0 }
 0x1a5   :  { %2314 = vmatmul.mubr.bf16.vlgmr.msra.gmra.mxu0 %v1536_v16 }
 0x22a   :  { %v2253_v26 = vpop.f32.mrf.mxu1 }
 0x22c   :  { %v2254_v27 = vpop.f32.mrf.mxu1 }
 0x22d   :  { %v2255_v30 = vadd.f32 %v2254_v27, %v2253_v26 }
 0x22e   :  { %v2256_v28 = vpop.f32.mrf.mxu1 }
 0x22f   :  { %v1771_v52 = vadd.f32 %v2255_v30, %v2128_v32 }
 0x230   :  { %v2257_v29 = vpop.f32.mrf.mxu1 }
 0x265   :  { %v1810_v33 = vpop.f32.mrf.mxu0 }
 0x266   :  { %v1811_v7 = vadd.f32 %v1810_v33, %v1771_v52 }
 0x267   :  { %v2315_v34 = vpop.f32.mrf.mxu0 }
 0x268   :  { %v1816_v35 = vmax.f32 %v1811_v7, 0.0 }
 0x269   :  { %v1813_v53 = vpop.f32.mrf.mxu0 }
 0x26a   :  { %v1817_v36 = vpack.c.bf16 %v1816_v35, %v1816_v35 }
 0x26b   :  { %v2316_v37 = vpop.f32.mrf.mxu0 }
 0x26c   :  { %2334 = vmatmul.mubr.bf16.vlgmr.msra.gmra.mxu1 %v1817_v36 }
 0x32c   :  { %v1923_v40 = vpop.f32.mrf.mxu1 }
 0x32d   :  { %v1924_v41 = vadd.f32 %v2153_v39, %v1923_v40 }
 0x32e   :  { %v2335_v42 = vpop.f32.mrf.mxu1 }
 0x32f   :  { %v1932_v43 = vsel %vm1931_vm1, %v1924_v41, -1e+30 }
 0x330   :  { %1933 = vmax.xlane.f32.xlu0 %v1932_v43  ;;  %v1926_v44 = vpop.f32.mrf.mxu1 }
 0x332   :  { %v2336_v45 = vpop.f32.mrf.mxu1 }
 0x3b9   :  { %v1934_v46 = vpop.xlane.xlu0 %1933 }
 0x3ba   :  { %v1935_v47 = vsub.f32 %v1932_v43, %v1934_v46 }
 0x3bc   :  { %v1936_v50 = vmul.f32 1.442695, %v1935_v47 }
 0x3be   :  { %2603 = vpow2.f32 %v1936_v50 }
 0x3cb   :  { %v2604_v51 = vpop.eup %2603 }
 0x3cc   :  { %1938 = vadd.xlane.f32.xlu0 %v2604_v51 }
 0x455   :  { %v1939_v54 = vpop.xlane.xlu0 %1938 }
 0x456   :  { %2605 = vlog2.f32 %v1939_v54 }
 0x463   :  { %v2606_v31 = vpop.eup %2605 }
 0x464   :  { %v1941_v55 = vmul.f32 0.6931472, %v2606_v31 }
 0x466   :  { %v1942_v56 = vsub.f32 %v1935_v47, %v1941_v55 }
 0x468   :  { %1943 = vst [vmem:[#allocation7] sm:$0xff] %v1942_v56 }
 0x469   :  { %2658 = shalt.err (!%p2655_p0)
}
 0x46a   :  { %1953 = dma.vmem_to_hbm [thread:$0]  %s1951_s21, 128, %s2853_s7, [#allocation4]  }
 0x46b   :  { %2671 = dma.done.wait [#allocation4], 128  }
 0x46c   :  { %2672 = vsyncadd [#allocation4], 4294967168 }
 0x46d   :  { %1957 = vsyncpa [#allocation3], 1 }
 0x46e   :  { %1958 = vsyncpa [#allocation6], 1 }
 0x46f   :  { %1959 = vsyncpa [#allocation4], 1 }

</bundles_post_ra>
